<compile_context>
chip_gen: v7x
topology: tpu7x:2x2x1
jax: 0.10.0
libtpu: 0.0.40
codegen_flags: <defaults>
</compile_context>

<pallas_src>
import jax
import jax.numpy as jnp
from jax.experimental import pallas as pl
from jax.experimental.pallas import tpu as pltpu

BETA = 0.5  # SmoothL1 beta for both Rot1 and Rot2


def _smooth_l1(diff):
    a = jnp.abs(diff)
    quad = (0.5 / BETA) * diff * diff   # (0.5/BETA) folded at trace time (==1.0)
    lin = a - 0.5 * BETA
    return jnp.where(a < BETA, quad, lin)


def fs_net_loss_R_kernel(packed_ref, sym_ref, out_ref):
    # packed_ref: (2, 2D, B)  -- [0] = [pred_Rot1.T ; pred_Rot2.T]
    #                            [1] = [gt_Rot1.T   ; gt_Rot2.T  ]
    # sym_ref:    (1, B)
    # out_ref:    (1, 2)      -- [rot1, rot2]
    two_d, b = packed_ref.shape[1], packed_ref.shape[2]
    d = two_d // 2

    diff = packed_ref[0] - packed_ref[1]                 # (2D, B) elementwise, VPU
    sl = _smooth_l1(diff)                                # (2D, B)

    row = jax.lax.broadcasted_iota(jnp.int32, (two_d, b), 0)
    is_rot1 = row < d                                    # first D sublane rows = Rot1
    sym_valid = sym_ref[...] != 1.0                      # (1, B), broadcasts over rows

    # Single full-tensor masked reductions (no per-sample intermediates).
    rot1_sum = jnp.sum(jnp.where(is_rot1, sl, 0.0), keepdims=True)          # (1, 1)
    rot2_sum = jnp.sum(
        jnp.where(jnp.logical_and(~is_rot1, sym_valid), sl, 0.0),
        keepdims=True)                                                      # (1, 1)
    valid = jnp.sum(sym_valid.astype(jnp.float32), keepdims=True)           # (1, 1)

    rot1 = rot1_sum * (1.0 / (b * d))                    # constant scale
    rot2_num = rot2_sum * (1.0 / d)
    rot2 = jnp.where(valid > 0.0,
                     rot2_num / jnp.maximum(valid, 1.0),
                     jnp.zeros_like(rot2_num))

    # Pack both scalars into the single (1, 2) output tile.
    lane = jax.lax.broadcasted_iota(jnp.int32, (1, 2), 1)
    out_ref[...] = jnp.where(lane == 0, rot1, rot2)


def fs_net_loss_R(pred_list, gt_list, sym):
    """pred_list/gt_list: dicts with 'Rot1', 'Rot2' arrays of shape (B, D) float32.
    sym: (B, 1) float32 (1 => symmetric sample, skipped for Rot2)."""
    pred1 = pred_list['Rot1'].astype(jnp.float32)
    gt1 = gt_list['Rot1'].astype(jnp.float32)
    pred2 = pred_list['Rot2'].astype(jnp.float32)
    gt2 = gt_list['Rot2'].astype(jnp.float32)
    sym = sym.astype(jnp.float32)

    B, D = pred1.shape

    # Wrapper-side (XLA, fused with producers) lane-dense packing:
    #   batch on the lane axis, D on sublanes, pred/gt stacked on a leading
    #   axis so everything arrives through one input DMA.
    pred_packed = jnp.concatenate([pred1.T, pred2.T], axis=0)   # (2D, B)
    gt_packed = jnp.concatenate([gt1.T, gt2.T], axis=0)         # (2D, B)
    packed = jnp.stack([pred_packed, gt_packed], axis=0)        # (2, 2D, B)
    sym_row = sym.reshape(B, 1).T                               # (1, B)

    out = pl.pallas_call(
        fs_net_loss_R_kernel,
        out_shape=jax.ShapeDtypeStruct((1, 2), jnp.float32),
        in_specs=[pl.BlockSpec(memory_space=pltpu.MemorySpace.VMEM),
                  pl.BlockSpec(memory_space=pltpu.MemorySpace.VMEM)],
        out_specs=pl.BlockSpec(memory_space=pltpu.MemorySpace.VMEM),
    )(packed, sym_row)

    # The PyTorch module scales BOTH Rot1 and Rot2 by rot_1_w (= 1).
    rot_1_w = 1.0
    return {'Rot1': rot_1_w * out[0, 0], 'Rot2': rot_1_w * out[0, 1]}


# ---------------- pure-JAX reference (for verification) ----------------
def _reference(pred_list, gt_list, sym):
    def sl1(p, g, beta):
        d = p - g
        a = jnp.abs(d)
        return jnp.where(a < beta, 0.5 * d * d / beta, a - 0.5 * beta)

    per1 = jnp.mean(sl1(pred_list['Rot1'], gt_list['Rot1'], BETA), axis=-1)
    rot1 = jnp.mean(per1)
    per2 = jnp.mean(sl1(pred_list['Rot2'], gt_list['Rot2'], BETA), axis=-1)
    mask = (sym[:, 0] != 1.0).astype(jnp.float32)
    valid = jnp.sum(mask)
    rot2 = jnp.where(valid > 0.0, jnp.sum(per2 * mask) / jnp.maximum(valid, 1.0), 0.0)
    return {'Rot1': rot1, 'Rot2': rot2}


if __name__ == "__main__":
    key = jax.random.PRNGKey(0)
    k1, k2, k3, k4 = jax.random.split(key, 4)

    B, D = 4, 3  # FS-Net rotation axis vectors: (batch, 3)
    pred_list = {
        'Rot1': jax.random.normal(k1, (B, D), dtype=jnp.float32),
        'Rot2': jax.random.normal(k2, (B, D), dtype=jnp.float32),
    }
    gt_list = {
        'Rot1': jax.random.normal(k3, (B, D), dtype=jnp.float32),
        'Rot2': jax.random.normal(k4, (B, D), dtype=jnp.float32),
    }
    # sym: mark sample 1 as symmetric (skipped for Rot2), rest asymmetric.
    sym = jnp.array([[0.0], [1.0], [0.0], [0.0]], dtype=jnp.float32)

    out = fs_net_loss_R(pred_list, gt_list, sym)
    out = jax.tree_util.tree_map(jax.block_until_ready, out)
    ref = _reference(pred_list, gt_list, sym)
    assert abs(float(out['Rot1']) - float(ref['Rot1'])) < 1e-5
    assert abs(float(out['Rot2']) - float(ref['Rot2'])) < 1e-5

    # Edge case: all samples symmetric -> Rot2 must be exactly 0.
    sym_all = jnp.ones((B, 1), dtype=jnp.float32)
    out_all = fs_net_loss_R(pred_list, gt_list, sym_all)
    out_all = jax.tree_util.tree_map(jax.block_until_ready, out_all)
    ref_all = _reference(pred_list, gt_list, sym_all)
    assert abs(float(out_all['Rot1']) - float(ref_all['Rot1'])) < 1e-5
    assert abs(float(out_all['Rot2']) - 0.0) < 1e-7

    print("KERNEL_OK")
</pallas_src>

<mosaic_0001>
module attributes {stable_mosaic.version = 11 : i64} {
  func.func @fs_net_loss_R_kernel(%arg0: memref<2x6x4xf32, #tpu.memory_space<vmem>>, %arg1: memref<1x4xf32, #tpu.memory_space<vmem>>, %arg2: memref<1x2xf32, #tpu.memory_space<vmem>>) attributes {dimension_semantics = [], scalar_prefetch = 0 : i64, scratch_operands = 0 : i64, tpu.core_type = #tpu.core_type<tc>} {
    %c0 = arith.constant 0 : index
    %c0_0 = arith.constant 0 : index
    %c0_1 = arith.constant 0 : index
    %0 = vector.load %arg0[%c0, %c0_0, %c0_1] : memref<2x6x4xf32, #tpu.memory_space<vmem>>, vector<1x6x4xf32>
    %1 = vector.shape_cast %0 : vector<1x6x4xf32> to vector<6x4xf32>
    %c1 = arith.constant 1 : index
    %c0_2 = arith.constant 0 : index
    %c0_3 = arith.constant 0 : index
    %2 = vector.load %arg0[%c1, %c0_2, %c0_3] : memref<2x6x4xf32, #tpu.memory_space<vmem>>, vector<1x6x4xf32>
    %3 = vector.shape_cast %2 : vector<1x6x4xf32> to vector<6x4xf32>
    %4 = arith.subf %1, %3 : vector<6x4xf32>
    %5 = math.absf %4 : vector<6x4xf32>
    %cst = arith.constant 1.000000e+00 : f32
    %6 = vector.broadcast %cst : f32 to vector<6x4xf32>
    %7 = arith.mulf %6, %4 : vector<6x4xf32>
    %8 = arith.mulf %7, %4 : vector<6x4xf32>
    %cst_4 = arith.constant 2.500000e-01 : f32
    %9 = vector.broadcast %cst_4 : f32 to vector<6x4xf32>
    %10 = arith.subf %5, %9 : vector<6x4xf32>
    %cst_5 = arith.constant 5.000000e-01 : f32
    %11 = vector.broadcast %cst_5 : f32 to vector<6x4xf32>
    %12 = arith.cmpf olt, %5, %11 : vector<6x4xf32>
    %13 = arith.select %12, %8, %10 : vector<6x4xi1>, vector<6x4xf32>
    %14 = tpu.iota {dimensions = array<i32: 0>} : vector<6x4xi32>
    %c3_i32 = arith.constant 3 : i32
    %15 = vector.broadcast %c3_i32 : i32 to vector<6x4xi32>
    %16 = arith.cmpi slt, %14, %15 : vector<6x4xi32>
    %c0_6 = arith.constant 0 : index
    %c0_7 = arith.constant 0 : index
    %17 = vector.load %arg1[%c0_6, %c0_7] : memref<1x4xf32, #tpu.memory_space<vmem>>, vector<1x4xf32>
    %cst_8 = arith.constant 1.000000e+00 : f32
    %18 = vector.broadcast %cst_8 : f32 to vector<1x4xf32>
    %19 = arith.cmpf one, %17, %18 : vector<1x4xf32>
    %cst_9 = arith.constant 0.000000e+00 : f32
    %20 = vector.broadcast %cst_9 : f32 to vector<6x4xf32>
    %21 = arith.select %16, %13, %20 : vector<6x4xi1>, vector<6x4xf32>
    %22 = vector.shape_cast %21 : vector<6x4xf32> to vector<1x6x4xf32>
    %cst_10 = arith.constant dense<0.000000e+00> : vector<1xf32>
    %23 = vector.multi_reduction <add>, %22, %cst_10 [1, 2] : vector<1x6x4xf32> to vector<1xf32>
    %24 = vector.shape_cast %23 : vector<1xf32> to vector<1x1x1xf32>
    %25 = vector.extract %24[0, 0, 0] : f32 from vector<1x1x1xf32>
    %26 = vector.broadcast %25 : f32 to vector<1x1xf32>
    %cst_11 = arith.constant dense<true> : vector<6x4xi1>
    %27 = arith.xori %16, %cst_11 : vector<6x4xi1>
    %28 = vector.broadcast %19 : vector<1x4xi1> to vector<6x4xi1>
    %29 = arith.andi %27, %28 : vector<6x4xi1>
    %cst_12 = arith.constant 0.000000e+00 : f32
    %30 = vector.broadcast %cst_12 : f32 to vector<6x4xf32>
    %31 = arith.select %29, %13, %30 : vector<6x4xi1>, vector<6x4xf32>
    %32 = vector.shape_cast %31 : vector<6x4xf32> to vector<1x6x4xf32>
    %cst_13 = arith.constant dense<0.000000e+00> : vector<1xf32>
    %33 = vector.multi_reduction <add>, %32, %cst_13 [1, 2] : vector<1x6x4xf32> to vector<1xf32>
    %34 = vector.shape_cast %33 : vector<1xf32> to vector<1x1x1xf32>
    %35 = vector.extract %34[0, 0, 0] : f32 from vector<1x1x1xf32>
    %36 = vector.broadcast %35 : f32 to vector<1x1xf32>
    %37 = arith.extui %19 : vector<1x4xi1> to vector<1x4xi32>
    %38 = arith.sitofp %37 : vector<1x4xi32> to vector<1x4xf32>
    %39 = vector.shape_cast %38 : vector<1x4xf32> to vector<1x1x4xf32>
    %cst_14 = arith.constant dense<0.000000e+00> : vector<1xf32>
    %40 = vector.multi_reduction <add>, %39, %cst_14 [1, 2] : vector<1x1x4xf32> to vector<1xf32>
    %41 = vector.shape_cast %40 : vector<1xf32> to vector<1x1x1xf32>
    %42 = vector.extract %41[0, 0, 0] : f32 from vector<1x1x1xf32>
    %43 = vector.broadcast %42 : f32 to vector<1x1xf32>
    %cst_15 = arith.constant 0.0833333358 : f32
    %44 = vector.broadcast %cst_15 : f32 to vector<1x1xf32>
    %45 = arith.mulf %26, %44 : vector<1x1xf32>
    %cst_16 = arith.constant 0.333333343 : f32
    %46 = vector.broadcast %cst_16 : f32 to vector<1x1xf32>
    %47 = arith.mulf %36, %46 : vector<1x1xf32>
    %cst_17 = arith.constant 0.000000e+00 : f32
    %48 = vector.broadcast %cst_17 : f32 to vector<1x1xf32>
    %49 = arith.cmpf ogt, %43, %48 : vector<1x1xf32>
    %cst_18 = arith.constant 1.000000e+00 : f32
    %50 = vector.broadcast %cst_18 : f32 to vector<1x1xf32>
    %51 = arith.maximumf %43, %50 : vector<1x1xf32>
    %52 = arith.divf %47, %51 : vector<1x1xf32>
    %cst_19 = arith.constant 0.000000e+00 : f32
    %53 = vector.broadcast %cst_19 : f32 to vector<1x1xf32>
    %54 = arith.select %49, %52, %53 : vector<1x1xi1>, vector<1x1xf32>
    %55 = tpu.iota {dimensions = array<i32: 1>} : vector<1x2xi32>
    %c0_i32 = arith.constant 0 : i32
    %56 = vector.broadcast %c0_i32 : i32 to vector<1x2xi32>
    %57 = arith.cmpi eq, %55, %56 : vector<1x2xi32>
    %58 = vector.shape_cast %45 : vector<1x1xf32> to vector<1x1xf32>
    %59 = vector.broadcast %58 : vector<1x1xf32> to vector<1x2xf32>
    %60 = vector.shape_cast %54 : vector<1x1xf32> to vector<1x1xf32>
    %61 = vector.broadcast %60 : vector<1x1xf32> to vector<1x2xf32>
    %62 = arith.select %57, %59, %61 : vector<1x2xi1>, vector<1x2xf32>
    %c0_20 = arith.constant 0 : index
    %c0_21 = arith.constant 0 : index
    %63 = vector.load %arg2[%c0_20, %c0_21] : memref<1x2xf32, #tpu.memory_space<vmem>>, vector<1x2xf32>
    tpu.vector_store %arg2[%c0_20, %c0_21], %62 {strides = array<i32>} : memref<1x2xf32, #tpu.memory_space<vmem>>, vector<1x2xf32>,
    return
  }
}

</mosaic_0001>

<bundles_post_ra>
// kernel: tpu_custom_call.1
= control target key start
LH: loop header
LB: loop body
LE: loop exit
PB: predicated region body
PF: predicated region fallthrough
CT: control target
= control target key end

     0   :  { %vm60_vm0 = vcmask 24576   ;;  %v21_v1 = vlaneseq  ;;  %v138_v4 = vmov 0.0   ;;  %s178_s0 = inlined_call_operand.vmem [shape: f32[2,6,4], index: 0, kind: input, shape index: {}]   ;;  %s179_s1 = inlined_call_operand.vmem [shape: f32[1,4], index: 1, kind: input, shape index: {}]   ;;  %s180_s2 = inlined_call_operand.hbm [shape: f32[1,2], index: 2, kind: output, shape index: {}]  }
   0x1   :  { %v24_v0 = vld [vmem:[%s179_s1] sm:$0x1]  ;;  %v99_v3 = vld [vmem:[%s178_s0 + $0x8] sm:$0x3f] }
   0x2   :  { %vm25_vm1 = vcmp.ne.f32.partialorder %v24_v0, 1.0  ;;  %v12_v2 = vld [vmem:[%s178_s0] sm:$0x3f]  ;;  %v22_v6 = vshrl.u32 %v21_v1, 7 }
   0x3   :  { %v101_v5 = vsel %vm25_vm1, 1.0, %v138_v4  ;;  %v15_v7 = vsub.f32 %v12_v2, %v99_v3 }
   0x4   :  { %7 = vsyncpa [#allocation3], 0  ;;  %v61_v8 = vsel %vm60_vm0, %v101_v5, 0.0  ;;  %v139_v9 = vmov 0   ;;  %v43_v11 = vsub.s32 0, %v22_v6  ;;  %vm23_vm2 = vcmp.lt.s32.totalorder %v22_v6, 3 }
   0x5   :  { %v40_v10 = vsel %vm25_vm1, 1, %v139_v9  ;;  %62 = vadd.xlane.f32.xlu1 %v61_v8  ;;  %v16_v12 = vand.u32 2147483647, %v15_v7  ;;  %v17_v13 = vmul.f32 %v15_v7, %v15_v7  ;;  %vm140_vm4 = vmmov 1   ;;  %s141_s16 = smov [#allocation2]  }
   0x6   :  { %v44_v14 = vrot.slane %v40_v10, %v43_v11  ;;  %vm39_vm5 = vmxor %vm23_vm2, %vm140_vm4  ;;  %vm27_vm6 = vcmask 29696   ;;  %v80_v45 = vand.u32 127, %v21_v1  ;;  %s91_s17 = sshll.u32 %s141_s16, 4  ;;  %vm83_vm11 = vcmask 8192   ;;  %s92_s17 = int_to_ptr.vmem [resolvable:$true] %s91_s17 }
   0x7   :  { %v100_v15 = vadd.f32 -0.25, %v16_v12  ;;  %vm19_vm3 = vcmp.lt.f32.partialorder %v16_v12, 0.5  ;;  %s114_s18 = scalar_lea.vmem %s92_s17, 16  ;;  %s118_s19 = scalar_lea.vmem %s92_s17, 32 }
   0x8   :  { %vm45_vm7 = vcmp.eq.s32.totalorder %v44_v14, 1  ;;  %vm81_vm9 = vcmp.eq.s32.totalorder %v80_v45, 0  ;;  %p115_p0 = scmp.ne.s32.totalorder %s92_s17, %s114_s18  ;;  %p119_p1 = scmp.lt.s32.totalorder %s92_s17, %s92_s17 }
   0x9   :  { %v20_v16 = vsel %vm19_vm3, %v17_v13, %v100_v15  ;;  %vm46_vm8 = vmand %vm39_vm5, %vm45_vm7  ;;  %p120_p2 = scmp.lt.s32.totalorder %s118_s19, %s114_s18 }
   0xa   :  { %v26_v17 = vsel %vm23_vm2, %v20_v16, 0.0  ;;  %v47_v19 = vsel %vm46_vm8, %v20_v16, 0.0 }
   0xb   :  { %v28_v18 = vsel %vm27_vm6, %v26_v17, 0.0  ;;  %v48_v20 = vsel %vm27_vm6, %v47_v19, 0.0  ;;  %p121_p3 = por %p120_p2, %p119_p1 }
   0xc   :  { %29 = vadd.xlane.f32.xlu0 %v28_v18 }
   0xd   :  { %p122_p4 = pnand %p121_p3, %p115_p0 }
  0x10   :  { %49 = vadd.xlane.f32.xlu0 %v48_v20 }
  0x92   :  { %v63_v21 = vpop.xlane.xlu1 %62 }
  0x93   :  { %v64_v22 = vrot.slane %v63_v21, 4 }
  0x95   :  { %v65_v23 = vadd.f32 %v64_v22, %v63_v21 }
  0x97   :  { %v66_v27 = vrot.slane %v65_v23, 2 }
  0x99   :  { %v30_v24 = vpop.xlane.xlu0 %29  ;;  %v67_v33 = vadd.f32 %v66_v27, %v65_v23 }
  0x9a   :  { %v31_v25 = vrot.slane %v30_v24, 4 }
  0x9b   :  { %v68_v38 = vrot.slane %v67_v33, 1 }
  0x9c   :  { %v32_v26 = vadd.f32 %v31_v25, %v30_v24 }
  0x9d   :  { %v50_v28 = vpop.xlane.xlu0 %49  ;;  %v69_v41 = vadd.f32 %v68_v38, %v67_v33 }
  0x9e   :  { %v33_v29 = vrot.slane %v32_v26, 2  ;;  %v51_v30 = vrot.slane %v50_v28, 4 }
  0xa0   :  { %v52_v31 = vadd.f32 %v51_v30, %v50_v28  ;;  %v34_v32 = vadd.f32 %v33_v29, %v32_v26 }
  0xa2   :  { %v53_v34 = vrot.slane %v52_v31, 2  ;;  %v35_v35 = vrot.slane %v34_v32, 1 }
  0xa4   :  { %v54_v36 = vadd.f32 %v53_v34, %v52_v31  ;;  %v36_v37 = vadd.f32 %v35_v35, %v34_v32 }
  0xa6   :  { %102 = vpush %v36_v37  ;;  %v55_v39 = vrot.slane %v54_v36, 1 }
  0xa8   :  { %v56_v40 = vadd.f32 %v55_v39, %v54_v36 }
  0xaa   :  { %104 = vpush %v56_v40 }
  0xab   :  { %106 = vpush %v69_v41 }
  0xd7   :  { %s103_s0 = spop %102 }
  0xd8   :  { %v38_v46 = vstv %s103_s0 }
  0xd9   :  { %v72_v50 = vmul.f32 0.083333336, %v38_v46 }
  0xdb   :  { %s105_s1 = spop %104 }
  0xdc   :  { %s107_s15 = spop %106  ;;  %v58_v44 = vstv %s105_s1 }
  0xdd   :  { %v71_v42 = vstv %s107_s15  ;;  %v73_v47 = vmul.f32 0.33333334, %v58_v44 }
  0xde   :  { %v75_v43 = vmax.f32 %v71_v42, 1.0  ;;  %vm74_vm10 = vcmp.gt.f32.partialorder %v71_v42, 0.0 }
  0xe0   :  { %112 = vrcp.f32 %v75_v43 }
  0xea   :  { %v113_v48 = vpop.eup %112 }
  0xeb   :  { %v77_v49 = vmul.f32 %v113_v48, %v73_v47 }
  0xed   :  { %v78_v51 = vsel %vm74_vm10, %v77_v49, 0.0 }
  0xee   :  { %v82_v52 = vsel %vm81_vm9, %v72_v50, %v78_v51 }
  0xef   :  { %84 = vst.msk [vmem:[#allocation2] sm:$0x1] %vm83_vm11, %v82_v52 }
  0xf0   :  { %125 = shalt.err (!%p122_p4)
}
  0xf1   :  { %s126_s22 = scalar_lea.hbm %s180_s2, 16 }
  0xf2   :  { %p127_p5 = scmp.ne.s32.totalorder %s180_s2, %s126_s22  ;;  %p130_p6 = scmp.lt.u32.totalorder %s126_s22, %s180_s2 }
  0xf4   :  { %p132_p7 = pnand %p130_p6, %p127_p5 }
  0xf6   :  { %135 = shalt.err (!%p132_p7)
}
  0xf7   :  { %94 = dma.vmem_to_hbm [thread:$0]  %s92_s17, 16, %s180_s2, [#allocation3]  }
  0xf8   :  { %136 = dma.done.wait [#allocation3], 16  }
  0xf9   :  { %137 = vsyncadd [#allocation3], 4294967280 }
  0xfa   :  { %98 = vsyncpa [#allocation3], 1 }

</bundles_post_ra>
